<compile_context>
chip_gen: v7x
topology: tpu7x:2x2x1
jax: 0.10.0
libtpu: 0.0.40
codegen_flags: <defaults>
</compile_context>

<pallas_src>
import itertools
import numpy as np
import jax
import jax.numpy as jnp
from jax.experimental import pallas as pl
from jax.experimental.pallas import tpu as pltpu

EPS = 1e-5                 # nn.BatchNorm1d default
LANE = 128
TILE_N = 256               # output-voxel rows per grid step (conv + stats kernel)
TILE_BN = 512              # output-voxel rows per grid step (BN + ReLU kernel)
MAX_RESIDENT_X_BYTES = 8 * 1024 * 1024   # guard for the VMEM-resident gather path


def _round_up(x, m):
    return (x + m - 1) // m * m


# ----------------------------------------------------------------------------
# Capability probe: does jnp.take(values, idx, axis=0) lower inside a Pallas
# TPU kernel on this jax/Mosaic build?  Probed at the real problem sizes.
# ----------------------------------------------------------------------------
def _probe_take_kernel(x_ref, i_ref, o_ref):
    o_ref[...] = jnp.take(x_ref[...], i_ref[0, :], axis=0)


def _in_kernel_take_supported(n_src, n_idx, c):
    try:
        xs = jnp.arange(n_src * c, dtype=jnp.float32).reshape(n_src, c)
        idx = ((jnp.arange(n_idx, dtype=jnp.int32) * 7 + 3) % n_src).reshape(1, n_idx)
        o = pl.pallas_call(
            _probe_take_kernel,
            out_shape=jax.ShapeDtypeStruct((n_idx, c), jnp.float32),
        )(xs, idx)
        return bool(jnp.all(o == xs[idx[0]]))
    except Exception:
        return False


# ----------------------------------------------------------------------------
# Shared tail: store pre-BN conv tile (bf16) + per-tile BatchNorm partials.
# ----------------------------------------------------------------------------
def _conv_tail(acc, conv_ref, psum_ref, psumsq_ref):
    cout_p = conv_ref.shape[1]
    conv_ref[...] = acc.astype(conv_ref.dtype)
    s = jnp.sum(acc, axis=0, keepdims=True)           # [1, Cout_p]
    ss = jnp.sum(acc * acc, axis=0, keepdims=True)    # [1, Cout_p]
    # Replicate across 8 sublanes so the stats block stays (8, 128)-tiled.
    psum_ref[0] = jnp.broadcast_to(s, (8, cout_p))
    psumsq_ref[0] = jnp.broadcast_to(ss, (8, cout_p))


# ----------------------------------------------------------------------------
# Kernel 1a: in-kernel row gather (VMEM-resident features) + im2col + matmul.
# ----------------------------------------------------------------------------
def deconv_gather_kernel(nbr_ref, x_ref, w_ref, conv_ref, psum_ref, psumsq_ref,
                         col_ref):
    # nbr_ref : [K, TILE_N]      int32 (row index into x_ref; dead taps -> zero row)
    # x_ref   : [N_in_p, Cin]    f32   (whole voxel-feature table, VMEM resident)
    # w_ref   : [KC_p, Cout_p]   bf16  (im2col-packed weights)
    # conv_ref: [TILE_N, Cout_p] bf16  (pre-BN conv output tile)
    # psum/psumsq : [1, 8, Cout_p] f32 (per-tile BN partial statistics)
    # col_ref : [TILE_N, KC_p]   bf16  (im2col scratch)
    k_vol = nbr_ref.shape[0]
    cin = x_ref.shape[1]
    kc = k_vol * cin
    kc_p = col_ref.shape[1]
    tile_n = col_ref.shape[0]

    xv = x_ref[...]                                            # [N_in_p, Cin] f32
    if kc_p > kc:
        # zero the padding lanes every step (scratch is persistent & megacore-split)
        col_ref[:, kc:] = jnp.zeros((tile_n, kc_p - kc), jnp.bfloat16)

    # Static unroll over the K=27 offsets; every iteration's values die at the
    # store into the VMEM im2col scratch, so no long vreg live ranges.
    for k in range(k_vol):
        idx = nbr_ref[k, :]                                    # [TILE_N] int32, in-bounds
        rows = jnp.take(xv, idx, axis=0)                       # [TILE_N, Cin] sublane gather
        col_ref[:, k * cin:(k + 1) * cin] = rows.astype(jnp.bfloat16)

    # One 512-deep bf16 MXU contraction instead of 27 shallow 128-deep panels.
    acc = jnp.dot(col_ref[...], w_ref[...], preferred_element_type=jnp.float32)
    _conv_tail(acc, conv_ref, psum_ref, psumsq_ref)


# ----------------------------------------------------------------------------
# Kernel 1b (fallback): im2col built by XLA outside; kernel = matmul + stats.
# ----------------------------------------------------------------------------
def deconv_im2col_kernel(col_ref, w_ref, conv_ref, psum_ref, psumsq_ref):
    acc = jnp.dot(col_ref[...], w_ref[...], preferred_element_type=jnp.float32)
    _conv_tail(acc, conv_ref, psum_ref, psumsq_ref)


# ----------------------------------------------------------------------------
# Kernel 2: BatchNorm (global batch statistics) + ReLU on 512-row tiles.
# ----------------------------------------------------------------------------
def bn_relu_kernel(y_ref, scale_ref, shift_ref, out_ref):
    y = y_ref[...].astype(jnp.float32)
    out_ref[...] = jnp.maximum(y * scale_ref[...] + shift_ref[...], 0.0)


# ----------------------------------------------------------------------------
# Wrapper: BasicDeconvolutionBlock forward.
# ----------------------------------------------------------------------------
def basic_deconv_block(x, nbr, weight, gamma, beta):
    """
    x      : [N_in, Cin]    f32 voxel features (SparseTensor.F layout)
    nbr    : [K, N_out]     int32 transposed-conv kernel map (-1 = no neighbor)
    weight : [K, Cin, Cout] f32 spnn.Conv3d weight (transposed conv, no bias)
    gamma, beta : [Cout]    f32 BatchNorm affine parameters
    returns [N_out, Cout]   f32
    """
    N_in, Cin = x.shape
    K, N_out = nbr.shape
    Cout = weight.shape[2]

    KC = K * Cin
    KC_p = _round_up(KC, LANE)
    Cout_p = _round_up(Cout, LANE)
    # even number of TILE_N tiles -> balanced "parallel" axis on v7x's 2 TCs
    N_out_p = _round_up(N_out, max(TILE_BN, 2 * TILE_N))
    n_tiles = N_out_p // TILE_N
    n_tiles_bn = N_out_p // TILE_BN
    # at least one guaranteed-zero row (index N_in) for dead / padded taps
    N_in_p = _round_up(N_in + 1, 8)

    # ---- host-side layout plumbing -------------------------------------------
    # im2col-packed weight: w_p[k*Cin + c, o] = weight[k, c, o]
    w_p = jnp.zeros((KC_p, Cout_p), jnp.bfloat16).at[:KC, :Cout].set(
        weight.reshape(KC, Cout).astype(jnp.bfloat16))
    # sanitized neighbor table: dead / out-of-range taps point at the zero row
    nbr_ok = (nbr >= 0) & (nbr < N_in)
    nbr_t = jnp.full((K, N_out_p), N_in, jnp.int32).at[:, :N_out].set(
        jnp.where(nbr_ok, jnp.clip(nbr, 0, N_in - 1), N_in).astype(jnp.int32))

    out_shapes = (
        jax.ShapeDtypeStruct((N_out_p, Cout_p), jnp.bfloat16),    # pre-BN conv (bf16)
        jax.ShapeDtypeStruct((n_tiles, 8, Cout_p), jnp.float32),  # per-tile sum
        jax.ShapeDtypeStruct((n_tiles, 8, Cout_p), jnp.float32),  # per-tile sum of squares
    )
    out_specs = (
        pl.BlockSpec((TILE_N, Cout_p), lambda i: (i, 0)),
        pl.BlockSpec((1, 8, Cout_p), lambda i: (i, 0, 0)),
        pl.BlockSpec((1, 8, Cout_p), lambda i: (i, 0, 0)),
    )
    matmul_flops = 2 * N_out_p * KC_p * Cout_p

    x_res_bytes = N_in_p * Cin * 4
    use_take = (x_res_bytes <= MAX_RESIDENT_X_BYTES
                and _in_kernel_take_supported(N_in_p, TILE_N, Cin))

    if use_take:
        # f32 feature table with a trailing zero row; Cin stays un-padded so the
        # resident block is small even at realistic voxel counts.
        x_res = jnp.zeros((N_in_p, Cin), jnp.float32).at[:N_in, :].set(
            x.astype(jnp.float32))
        vmem_need = (2 * K * TILE_N * 4 + 2 * x_res_bytes + 2 * KC_p * Cout_p * 2
                     + 2 * TILE_N * Cout_p * 2 + 4 * 8 * Cout_p * 4
                     + TILE_N * KC_p * 2)
        conv, psum, psumsq = pl.pallas_call(
            deconv_gather_kernel,
            grid=(n_tiles,),
            in_specs=[
                pl.BlockSpec((K, TILE_N), lambda i: (0, i)),      # neighbor tile
                pl.BlockSpec((N_in_p, Cin), lambda i: (0, 0)),    # resident features
                pl.BlockSpec((KC_p, Cout_p), lambda i: (0, 0)),   # packed weights
            ],
            out_specs=out_specs,
            out_shape=out_shapes,
            scratch_shapes=[pltpu.VMEM((TILE_N, KC_p), jnp.bfloat16)],
            compiler_params=pltpu.CompilerParams(
                dimension_semantics=("parallel",),
                vmem_limit_bytes=int(min(max(vmem_need + (2 << 20), 8 << 20),
                                         48 << 20))),
            cost_estimate=pl.CostEstimate(
                flops=matmul_flops,
                transcendentals=0,
                bytes_accessed=(K * N_out_p * 4 + x_res_bytes + KC_p * Cout_p * 2
                                + N_out_p * Cout_p * 2
                                + 2 * n_tiles * 8 * Cout_p * 4)),
        )(nbr_t, x_res, w_p)
    else:
        # TODO(synk): scalar-prefetched pltpu.make_async_copy row-gather for
        # feature tables that cannot stay VMEM-resident; for now the (linear)
        # im2col gather runs in XLA and the Pallas kernel does matmul + stats.
        xz = jnp.concatenate(
            [x.astype(jnp.float32), jnp.zeros((1, Cin), jnp.float32)], axis=0)
        gathered = jnp.take(xz, nbr_t[:, :N_out].reshape(-1), axis=0)   # [K*N_out, Cin]
        im2col = jnp.transpose(gathered.reshape(K, N_out, Cin),
                               (1, 0, 2)).reshape(N_out, KC)
        im2col_p = jnp.zeros((N_out_p, KC_p), jnp.bfloat16).at[:N_out, :KC].set(
            im2col.astype(jnp.bfloat16))
        conv, psum, psumsq = pl.pallas_call(
            deconv_im2col_kernel,
            grid=(n_tiles,),
            in_specs=[
                pl.BlockSpec((TILE_N, KC_p), lambda i: (i, 0)),
                pl.BlockSpec((KC_p, Cout_p), lambda i: (0, 0)),
            ],
            out_specs=out_specs,
            out_shape=out_shapes,
            compiler_params=pltpu.CompilerParams(
                dimension_semantics=("parallel",),
                vmem_limit_bytes=32 * 1024 * 1024),
            cost_estimate=pl.CostEstimate(
                flops=matmul_flops,
                transcendentals=0,
                bytes_accessed=(N_out_p * KC_p * 2 + KC_p * Cout_p * 2
                                + N_out_p * Cout_p * 2
                                + 2 * n_tiles * 8 * Cout_p * 4)),
        )(im2col_p, w_p)

    # ---- BatchNorm finalization (global training-mode batch statistics) ------
    # Padded rows / padded channels contribute exact zeros to the partial sums,
    # so dividing by the true N_out gives the correct statistics.
    # NOTE: E[x^2] - mean^2 in f32; fine at these feature scales (see review).
    mean = jnp.sum(psum[:, 0, :], axis=0, keepdims=True) / N_out            # [1, Cout_p]
    var = jnp.maximum(
        jnp.sum(psumsq[:, 0, :], axis=0, keepdims=True) / N_out - mean * mean, 0.0)
    gamma_p = jnp.ones((1, Cout_p), jnp.float32).at[0, :Cout].set(
        gamma.astype(jnp.float32))
    beta_p = jnp.zeros((1, Cout_p), jnp.float32).at[0, :Cout].set(
        beta.astype(jnp.float32))
    scale = gamma_p * jax.lax.rsqrt(var + EPS)
    shift = beta_p - mean * scale

    out = pl.pallas_call(
        bn_relu_kernel,
        grid=(n_tiles_bn,),
        in_specs=[
            pl.BlockSpec((TILE_BN, Cout_p), lambda i: (i, 0)),
            pl.BlockSpec((1, Cout_p), lambda i: (0, 0)),
            pl.BlockSpec((1, Cout_p), lambda i: (0, 0)),
        ],
        out_specs=pl.BlockSpec((TILE_BN, Cout_p), lambda i: (i, 0)),
        out_shape=jax.ShapeDtypeStruct((N_out_p, Cout_p), jnp.float32),
        compiler_params=pltpu.CompilerParams(
            dimension_semantics=("parallel",)),
    )(conv, scale, shift)

    return out[:N_out, :Cout]


# ----------------------------------------------------------------------------
# Pure-JAX reference (plain gather, f32) for verification.
# ----------------------------------------------------------------------------
def ref_deconv_block(x, nbr, weight, gamma, beta):
    K = weight.shape[0]
    N_out = nbr.shape[1]
    conv = jnp.zeros((N_out, weight.shape[2]), jnp.float32)
    for k in range(K):
        idx = nbr[k]
        g = jnp.where((idx >= 0)[:, None], x[jnp.clip(idx, 0, None)], 0.0)
        conv = conv + jnp.dot(g, weight[k], precision=jax.lax.Precision.HIGHEST)
    mean = jnp.mean(conv, axis=0, keepdims=True)
    var = jnp.mean(jnp.square(conv - mean), axis=0, keepdims=True)
    # mirror the kernel: pre-BN conv intermediate is stored in bf16, stats in f32
    conv_q = conv.astype(jnp.bfloat16).astype(jnp.float32)
    out = (conv_q - mean) * jax.lax.rsqrt(var + EPS) * gamma + beta
    return jnp.maximum(out, 0.0)


# ----------------------------------------------------------------------------
# Host-side glue: transposed-conv kernel map (stride = 1: out coords = in coords).
#   out[p] = sum_off W[off] * in[p - off]
# ----------------------------------------------------------------------------
def build_transposed_kernel_map(in_coords, out_coords, ks=3):
    offsets = list(itertools.product(range(-(ks // 2), ks // 2 + 1), repeat=3))
    K = len(offsets)
    lut = {tuple(c): i for i, c in enumerate(in_coords.tolist())}
    N_out = out_coords.shape[0]
    nbr = np.full((K, N_out), -1, dtype=np.int32)
    for k, off in enumerate(offsets):
        for i, c in enumerate(out_coords.tolist()):
            q = (c[0] - off[0], c[1] - off[1], c[2] - off[2])
            nbr[k, i] = lut.get(q, -1)
    return nbr


if __name__ == "__main__":
    # small, deterministic problem: N active voxels, Cin -> Cout deconv block
    N, Cin, Cout, KS = 300, 16, 32, 3
    K = KS ** 3

    key = jax.random.PRNGKey(0)
    k_coord, k_x, k_w, k_g, k_b = jax.random.split(key, 5)

    # distinct voxel coordinates in an 8^3 grid
    grid_sz = 8
    flat = np.asarray(jax.random.permutation(k_coord, grid_sz ** 3)[:N])
    coords = np.stack([flat // (grid_sz * grid_sz), (flat // grid_sz) % grid_sz,
                       flat % grid_sz], axis=1).astype(np.int32)
    nbr = jnp.asarray(build_transposed_kernel_map(coords, coords, ks=KS))  # [K, N]

    x = jax.random.normal(k_x, (N, Cin), jnp.float32)
    w = jax.random.normal(k_w, (K, Cin, Cout), jnp.float32) * 0.1  # Conv3d weight, no bias
    gamma = 1.0 + 0.1 * jax.random.normal(k_g, (Cout,), jnp.float32)
    beta = 0.1 * jax.random.normal(k_b, (Cout,), jnp.float32)

    out = jax.block_until_ready(basic_deconv_block(x, nbr, w, gamma, beta))

    # Reference uses the same bf16 rounding of x / W / pre-BN conv as the kernel
    # (accumulation and BN statistics are f32 in both).
    x_r = x.astype(jnp.bfloat16).astype(jnp.float32)
    w_r = w.astype(jnp.bfloat16).astype(jnp.float32)
    ref = jax.block_until_ready(ref_deconv_block(x_r, nbr, w_r, gamma, beta))

    np.testing.assert_allclose(np.asarray(out), np.asarray(ref), rtol=1e-2, atol=1e-2)
    assert out.shape == (N, Cout) and out.dtype == jnp.float32

    print("KERNEL_OK")
</pallas_src>

<mosaic_0001>
module attributes {stable_mosaic.version = 11 : i64} {
  func.func @deconv_im2col_kernel(%arg0: i32, %arg1: memref<256x512xbf16, #tpu.memory_space<vmem>>, %arg2: memref<512x128xbf16, #tpu.memory_space<vmem>>, %arg3: memref<256x128xbf16, #tpu.memory_space<vmem>>, %arg4: memref<1x8x128xf32, #tpu.memory_space<vmem>>, %arg5: memref<1x8x128xf32, #tpu.memory_space<vmem>>) attributes {dimension_semantics = [#tpu.dimension_semantics<parallel>], iteration_bounds = array<i64: 2>, scalar_prefetch = 0 : i64, scratch_operands = 0 : i64, tpu.core_type = #tpu.core_type<tc>, window_params = [{transform_indices = @transform_0, window_bounds = array<i64: 256, 512>}, {pipeline_mode = #tpu.pipeline_mode<synchronous>, transform_indices = @transform_1, window_bounds = array<i64: 512, 128>}, {transform_indices = @transform_2, window_bounds = array<i64: 256, 128>}, {transform_indices = @transform_3, window_bounds = array<i64: 1, 8, 128>}, {transform_indices = @transform_4, window_bounds = array<i64: 1, 8, 128>}]} {
    %c0 = arith.constant 0 : index
    %c0_0 = arith.constant 0 : index
    %0 = vector.load %arg1[%c0, %c0_0] : memref<256x512xbf16, #tpu.memory_space<vmem>>, vector<256x512xbf16>
    %c0_1 = arith.constant 0 : index
    %c0_2 = arith.constant 0 : index
    %1 = vector.load %arg2[%c0_1, %c0_2] : memref<512x128xbf16, #tpu.memory_space<vmem>>, vector<512x128xbf16>
    %cst = arith.constant dense<0.000000e+00> : vector<256x128xf32>
    %2 = tpu.matmul %0, %1, %cst {dimension_numbers = #tpu.dot_dimension_numbers<[1], [0], [0], [1], [0, 0, 1, 1], [], []>} : vector<256x512xbf16>, vector<512x128xbf16>, vector<256x128xf32> -> vector<256x128xf32>
    %3 = arith.truncf %2 : vector<256x128xf32> to vector<256x128xbf16>
    %c0_3 = arith.constant 0 : index
    %c0_4 = arith.constant 0 : index
    %4 = vector.load %arg3[%c0_3, %c0_4] : memref<256x128xbf16, #tpu.memory_space<vmem>>, vector<256x128xbf16>
    tpu.vector_store %arg3[%c0_3, %c0_4], %3 {strides = array<i32>} : memref<256x128xbf16, #tpu.memory_space<vmem>>, vector<256x128xbf16>,
    %cst_5 = arith.constant dense<0.000000e+00> : vector<128xf32>
    %5 = vector.multi_reduction <add>, %2, %cst_5 [0] : vector<256x128xf32> to vector<128xf32>
    %6 = vector.shape_cast %5 : vector<128xf32> to vector<1x128xf32>
    %7 = arith.mulf %2, %2 : vector<256x128xf32>
    %cst_6 = arith.constant dense<0.000000e+00> : vector<128xf32>
    %8 = vector.multi_reduction <add>, %7, %cst_6 [0] : vector<256x128xf32> to vector<128xf32>
    %9 = vector.shape_cast %8 : vector<128xf32> to vector<1x128xf32>
    %10 = vector.shape_cast %6 : vector<1x128xf32> to vector<1x128xf32>
    %11 = vector.broadcast %10 : vector<1x128xf32> to vector<8x128xf32>
    %c0_7 = arith.constant 0 : index
    %c0_8 = arith.constant 0 : index
    %c0_9 = arith.constant 0 : index
    %12 = vector.load %arg4[%c0_7, %c0_8, %c0_9] : memref<1x8x128xf32, #tpu.memory_space<vmem>>, vector<1x8x128xf32>
    %13 = vector.shape_cast %12 : vector<1x8x128xf32> to vector<8x128xf32>
    %14 = vector.shape_cast %11 : vector<8x128xf32> to vector<1x8x128xf32>
    tpu.vector_store %arg4[%c0_7, %c0_8, %c0_9], %14 {strides = array<i32>} : memref<1x8x128xf32, #tpu.memory_space<vmem>>, vector<1x8x128xf32>,
    %15 = vector.shape_cast %9 : vector<1x128xf32> to vector<1x128xf32>
    %16 = vector.broadcast %15 : vector<1x128xf32> to vector<8x128xf32>
    %c0_10 = arith.constant 0 : index
    %c0_11 = arith.constant 0 : index
    %c0_12 = arith.constant 0 : index
    %17 = vector.load %arg5[%c0_10, %c0_11, %c0_12] : memref<1x8x128xf32, #tpu.memory_space<vmem>>, vector<1x8x128xf32>
    %18 = vector.shape_cast %17 : vector<1x8x128xf32> to vector<8x128xf32>
    %19 = vector.shape_cast %16 : vector<8x128xf32> to vector<1x8x128xf32>
    tpu.vector_store %arg5[%c0_10, %c0_11, %c0_12], %19 {strides = array<i32>} : memref<1x8x128xf32, #tpu.memory_space<vmem>>, vector<1x8x128xf32>,
    return
  }
  func.func @transform_0(%arg0: i32) -> (i32, i32) {
    %c0_i32 = arith.constant 0 : i32
    %c0_i32_0 = arith.constant 0 : i32
    return %arg0, %c0_i32 : i32, i32
  }
  func.func @transform_1(%arg0: i32) -> (i32, i32) {
    %c0_i32 = arith.constant 0 : i32
    %c0_i32_0 = arith.constant 0 : i32
    %c0_i32_1 = arith.constant 0 : i32
    return %c0_i32, %c0_i32_0 : i32, i32
  }
  func.func @transform_2(%arg0: i32) -> (i32, i32) {
    %c0_i32 = arith.constant 0 : i32
    %c0_i32_0 = arith.constant 0 : i32
    return %arg0, %c0_i32 : i32, i32
  }
  func.func @transform_3(%arg0: i32) -> (i32, i32, i32) {
    %c0_i32 = arith.constant 0 : i32
    %c0_i32_0 = arith.constant 0 : i32
    %c0_i32_1 = arith.constant 0 : i32
    return %arg0, %c0_i32, %c0_i32_0 : i32, i32, i32
  }
  func.func @transform_4(%arg0: i32) -> (i32, i32, i32) {
    %c0_i32 = arith.constant 0 : i32
    %c0_i32_0 = arith.constant 0 : i32
    %c0_i32_1 = arith.constant 0 : i32
    return %arg0, %c0_i32, %c0_i32_0 : i32, i32, i32
  }
}

</mosaic_0001>

<bundles_post_ra>
// kernel: tpu_custom_call.1
= control target key start
LH: loop header
LB: loop body
LE: loop exit
PB: predicated region body
PF: predicated region fallthrough
CT: control target
= control target key end

     0   :  { %10 = vsyncpa [#allocation3], 0  ;;  %s2971_s0 = inlined_call_operand.hbm [shape: bf16[512,512], index: 0, kind: input, shape index: {}]   ;;  %s2972_s1 = inlined_call_operand.hbm [shape: bf16[512,128], index: 1, kind: input, shape index: {}]   ;;  %s2973_s2 = inlined_call_operand.hbm [shape: bf16[512,128], index: 2, kind: output, shape index: {0}]   ;;  %s2974_s3 = inlined_call_operand.hbm [shape: f32[2,8,128], index: 3, kind: output, shape index: {1}]   ;;  %s2975_s4 = inlined_call_operand.hbm [shape: f32[2,8,128], index: 4, kind: output, shape index: {2}]  }
   0x1   :  { %12 = vsyncpa [#allocation3 + $0x1], 0 }
   0x2   :  { %13 = vsyncpa [#allocation6], 0 }
   0x3   :  { %14 = vsyncpa [#allocation4], 0 }
   0x4   :  { %16 = vsyncpa [#allocation4 + $0x1], 0 }
   0x5   :  { %17 = vsyncpa [#allocation9], 0 }
   0x6   :  { %19 = vsyncpa [#allocation9 + $0x1], 0  ;;  %s2609_s15 = smov 0   ;;  %s2611_s16 = smov 0  }
   0x7   :  { %s2613_s17 = smov 0   ;;  %s2615_s18 = smov 0  }
   0x8 LB: > { %s2630_s19 = sadd.s32 4294967295, %s2571_s18   ;;  %s1677_s20 = sadd.s32 4294967294, %s2571_s18   ;;  %s2571_s18 = sphi %s2615_s18, %s2995_s18   ;;  %s2567_s17 = sphi %s2613_s17, %s2994_s17   ;;  %s2563_s16 = sphi %s2611_s16, %s2993_s16   ;;  %s2559_s15 = sphi %s2609_s15, %s2992_s15  }
   0x9   : > { %p45_p0 = scmp.ne.s32.totalorder %s2563_s16, %s2559_s15  ;;  %p2976_p1 = scmp.eq.s32.totalorder %s2630_s19, 0 }
   0xa   : > { %p96_p3 = scmp.eq.s32.totalorder %s1677_s20, 1  ;;  %p1678_p5 = scmp.ge.s32.totalorder %s2571_s18, 1 }
   0xb   : > { %p2641_p4 = por %p2976_p1, %p45_p0  ;;  %p155_p7 = scmp.lt.s32.totalorder %s2571_s18, 3 }
   0xc   : > { %p2646_p6 = por %p96_p3, %p45_p0  ;;  %s2573_s24 = smov [#allocation5]  }
   0xd   : > { %s2979_s21 = scalar_select %p2641_p4, 1, 0 }
   0xe   : > { %s2980_s22 = scalar_select %p2646_p6, 1, 0 }
   0xf   : > { %p2651_p8 = pnand %p1678_p5, %p155_p7  ;;  %s167_s25 = sshll.u32 %s2573_s24, 4  ;;  %s2655_s25 = int_to_ptr.vmem [resolvable:$true] %s167_s25 }
  0x10   : > { %s2667_s27 = sadd.s32 1, %s2571_s18   ;;  %s32_s28 = sadd.s32 1, %s2567_s17 }
  0x11   : > { %s2981_s23 = scalar_select %p2651_p8, 1, 0 }
  0x12   : > { %p2194_p9 = pneg %p2651_p8  ;;  %s29_s29 = ssub.s32 %s2571_s18, %s2667_s27 }
  0x13   : > { %s2383_s6 = scalar_lea.hbm %s2972_s1, 4096 }
  0x14   : > { %p2662_p11 = pnand %p2194_p9, %p2976_p1  ;;  %p2384_p12 = scmp.ne.s32.totalorder %s2972_s1, %s2383_s6 }
  0x15   : > { %p2390_p5 = scmp.lt.u32.totalorder %s2383_s6, %s2972_s1 }
  0x16   : > { %p2385_p13 = pneg %p2662_p11 }
  0x18   : > { %p2386_p0 = pnand %p2385_p13, %p2384_p12 }
  0x1a   : > { %p2387_p3 = pneg %p2386_p0 }
  0x1c   : > { %p2392_p7 = pnand %p2390_p5, %p2387_p3 }
  0x1e   : > { %2395 = shalt.err (!%p2392_p7)
}
  0x1f   : > { %s2396_s11 = scalar_lea.vmem %s2655_s25, 4096  ;;  %p2404_p2 = scmp.lt.s32.totalorder %s2655_s25, %s2655_s25 }
  0x20   : > { %p2397_p9 = scmp.ne.s32.totalorder %s2655_s25, %s2396_s11  ;;  %p2405_p6 = scmp.lt.s32.totalorder %s2396_s11, %s2396_s11 }
  0x22   : > { %p2399_p10 = pnand %p2397_p9, %p2385_p13  ;;  %p2406_p4 = por %p2405_p6, %p2404_p2 }
  0x24   : > { %p2400_p1 = pneg %p2399_p10 }
  0x26   : > { %p2407_p8 = pnand %p2406_p4, %p2400_p1 }
  0x28   : > { %2410 = shalt.err (!%p2407_p8)
}
  0x29   : > { %s2574_s12 = smov 64   ;;  %s2575_s13 = smov 4  }
  0x2a   : > { %2197 = dma.hbm_to_vmem [thread:$0]  (!%p2662_p11), %s2972_s1, 4096, %s2655_s25, [#allocation6], %s2574_s12, %s2574_s12, %s2575_s13  }
  0x2b   : > { %p30_p2 = scmp.eq.s32.totalorder %s29_s29, 0  ;;  %p39_p1 = scmp.ne.s32.totalorder %s2567_s17, %s2563_s16 }
  0x2c   : > { %p40_p4 = scmp.eq.s32.totalorder %s2571_s18, 0  ;;  %p2213_p6 = scmp.lt.s32.totalorder %s2571_s18, 2 }
  0x2d   : > { %s2698_s30 = scalar_select %p30_p2, %s2567_s17, %s32_s28  }
  0x2e   : > { %p41_p8 = por %p40_p4, %p39_p1  ;;  %p2983_p10 = scmp.eq.s32.totalorder %s2630_s19, 1 }
  0x2f   : > { %s181_s6 = sand.u32 1, %s2567_s17   ;;  %s1829_s7 = sshll.u32 %s2571_s18, 13 }
  0x30   : > { %p2702_p12 = por %p2983_p10, %p39_p1  ;;  %s1681_s8 = sshll.u32 %s181_s6, 9 }
  0x31   : > { %s2711_s10 = scalar_lea.hbm %s2971_s0, %s1829_s7  ;;  %s185_s25 = scalar_lea.vmem [#allocation2], %s1681_s8 }
  0x32   : > { %s193_s28 = sshll.u32 %s185_s25, 4  ;;  %p2713_p11 = pnand %p2213_p6, %p41_p8  ;;  %s2717_s28 = int_to_ptr.vmem [resolvable:$true] %s193_s28 }
  0x33   : > { %s2719_s11 = scalar_lea.sflag [#allocation3], %s181_s6  ;;  %s2411_s12 = scalar_lea.hbm %s2711_s10, 8192 }
  0x34   : > { %p2412_p13 = scmp.ne.s32.totalorder %s2711_s10, %s2411_s12  ;;  %p2413_p0 = pneg %p2713_p11 }
  0x35   : > { %s2416_s24 = scalar_lea.hbm %s2971_s0, 16384  ;;  %p2417_p7 = scmp.lt.u32.totalorder %s2711_s10, %s2971_s0 }
  0x36   : > { %p2414_p3 = pnand %p2413_p0, %p2412_p13  ;;  %p2418_p9 = scmp.lt.u32.totalorder %s2416_s24, %s2411_s12 }
  0x37   : > { %p2420_p1 = scmp.lt.u32.totalorder %s2411_s12, %s2711_s10 }
  0x38   : > { %p2415_p5 = pneg %p2414_p3  ;;  %p2419_p2 = por %p2418_p9, %p2417_p7 }
  0x3a   : > { %p2421_p4 = por %p2420_p1, %p2419_p2 }
  0x3c   : > { %p2422_p6 = pnand %p2421_p4, %p2415_p5 }
  0x3e   : > { %2425 = shalt.err (!%p2422_p6)
}
  0x3f   : > { %s2426_s6 = scalar_lea.vmem %s2717_s28, 8192  ;;  %s2576_s26 = smov [#allocation2]  }
  0x40   : > { %p2427_p8 = scmp.ne.s32.totalorder %s2717_s28, %s2426_s6  ;;  %s2431_s9 = sshll.u32 %s2576_s26, 4  ;;  %s2432_s9 = int_to_ptr.vmem [resolvable:$false] %s2431_s9 }
  0x41   : > { %s2433_s25 = scalar_lea.vmem %s2432_s9, 16384  ;;  %p2434_p3 = scmp.lt.s32.totalorder %s2717_s28, %s2432_s9 }
  0x42   : > { %p2429_p10 = pnand %p2427_p8, %p2413_p0  ;;  %p2435_p7 = scmp.lt.s32.totalorder %s2433_s25, %s2426_s6 }
  0x44   : > { %p2430_p13 = pneg %p2429_p10  ;;  %p2436_p9 = por %p2435_p7, %p2434_p3 }
  0x46   : > { %p2437_p2 = pnand %p2436_p9, %p2430_p13 }
  0x48   : > { %2440 = shalt.err (!%p2437_p2)
}
  0x49   : > { %s2577_s12 = smov 256   ;;  %s2578_s13 = smov 16  }
  0x4a   : > { %2201 = dma.hbm_to_vmem [thread:$0]  (!%p2713_p11), %s2711_s10, 8192, %s2717_s28, %s2719_s11, %s2577_s12, %s2577_s12, %s2578_s13  }
  0x4b   : > { %p2986_p0 = scmp.ne.s32.totalorder %s2981_s23, 0 }
  0x4c   : > { %s2750_s14 = sand.u32 (!%p2986_p0), 1, %s2563_s16   ;;  %p2987_p5 = scmp.ne.s32.totalorder (!%p2986_p0), %s2979_s21, 0 }
  0x4d   : > { %205 = sbr.rel (%p2986_p0) target bundleno = 528 (0x210), region = 28  ;;  %s1686_s24 = sshll.u32 (!%p2986_p0), %s2750_s14, 9 }
  0x4e   : > { %s208_s7 = scalar_lea.sflag (!%p2986_p0), [#allocation3], %s2750_s14  ;;  %s2754_s8 = scalar_lea.vmem (!%p2986_p0), [#allocation2], %s1686_s24 }
  0x54   : > { %2542 = dma.done.wait (%p2987_p5), %s208_s7, 8192  }
  0x55   : > { %2544 = vsyncadd (%p2987_p5), %s208_s7, 4294959104  ;;  %p2988_p11 = scmp.eq.s32.totalorder %s2630_s19, 0 }
  0x57   : > { %2546 = dma.done.wait (%p2988_p11), [#allocation6], 4096   ;;  %p2989_p1 = pmov %p2988_p11 }
  0x58   : > { %v2255_v0 = vld [vmem:[#allocation5 + $0x40] sm:$0xff]   ;;  %v2259_v4 = vld [vmem:[#allocation5 + $0x48] sm:$0xff]   ;;  %v2263_v8 = vld [vmem:[#allocation5 + $0x50] sm:$0xff]   ;;  %s1688_s21 = sshll.u32 %s2750_s14, 7  ;;  %s1862_s10 = sshll.u32 %s2630_s19, 11 }
  0x59   : > { %2548 = vsyncadd (%p2989_p1), [#allocation6], 4294963200  ;;  %v2256_v1 = vld [vmem:[#allocation5 + $0xc0] sm:$0xff]   ;;  %1958 = vmatprep.subr.bf16.mxu0 %v2255_v0  ;;  %v2260_v5 = vld [vmem:[#allocation5 + $0xc8] sm:$0xff]   ;;  %s2829_s23 = scalar_lea.vmem [#allocation7], %s1688_s21  ;;  %s2851_s6 = scalar_lea.hbm %s2973_s2, %s1862_s10 }
  0x5a   : > { %v2257_v2 = vld [vmem:[#allocation5] sm:$0xff]   ;;  %2070 = vmatprep.subr.bf16.mxu1 %v2256_v1  ;;  %v2261_v6 = vld [vmem:[#allocation5 + $0x8] sm:$0xff]   ;;  %v2264_v9 = vld [vmem:[#allocation5 + $0xd0] sm:$0xff]   ;;  %s1507_s28 = sshll.u32 %s2829_s23, 4  ;;  %s1689_s26 = sshll.u32 %s2750_s14, 3  ;;  %s2853_s28 = int_to_ptr.vmem [resolvable:$true] %s1507_s28 }
  0x5b   : > { %v2258_v3 = vld [vmem:[#allocation5 + $0x80] sm:$0xff]   ;;  %1959 = vmatpush3.bf16.msra.mxu0 %v2257_v2  ;;  %v2262_v7 = vld [vmem:[#allocation5 + $0x88] sm:$0xff]   ;;  %v2265_v10 = vld [vmem:[#allocation5 + $0x10] sm:$0xff]   ;;  %s1484_s9 = scalar_lea.sflag [#allocation4], %s2750_s14  ;;  %s2441_s25 = scalar_lea.vmem %s2853_s28, 2048 }
  0x5c   : > { %2071 = vmatpush3.bf16.msra.mxu1 %v2258_v3  ;;  %1960 = vmatprep.subr.bf16.mxu0 %v2259_v4  ;;  %v2266_v11 = vld [vmem:[#allocation5 + $0x90] sm:$0xff]   ;;  %v2267_v12 = vld [vmem:[#allocation5 + $0x58] sm:$0xff]   ;;  %v2271_v16 = vld [vmem:[#allocation5 + $0x60] sm:$0xff]   ;;  %p2442_p4 = scmp.ne.s32.totalorder %s2853_s28, %s2441_s25  ;;  %s2579_s12 = smov [#allocation7]  }
  0x5d   : > { %2072 = vmatprep.subr.bf16.mxu1 %v2260_v5  ;;  %v2268_v13 = vld [vmem:[#allocation5 + $0xd8] sm:$0xff]   ;;  %v2272_v17 = vld [vmem:[#allocation5 + $0xe0] sm:$0xff]   ;;  %v2275_v20 = vld [vmem:[#allocation5 + $0x68] sm:$0xff]   ;;  %s2445_s13 = sshll.u32 %s2579_s12, 4  ;;  %s2446_s13 = int_to_ptr.vmem [resolvable:$false] %s2445_s13 }
  0x5e   : > { %v2269_v14 = vld [vmem:[#allocation5 + $0x18] sm:$0xff]   ;;  %v2273_v18 = vld [vmem:[#allocation5 + $0x20] sm:$0xff]   ;;  %v2276_v21 = vld [vmem:[#allocation5 + $0xe8] sm:$0xff]   ;;  %p2443_p6 = pnand %p2442_p4, %p2702_p12  ;;  %s2447_s24 = scalar_lea.vmem %s2446_s13, 4096 }
  0x5f   : > { %1961 = vmatpush3.bf16.msra.mxu0 %v2261_v6  ;;  %v2270_v15 = vld [vmem:[#allocation5 + $0x98] sm:$0xff]   ;;  %v2274_v19 = vld [vmem:[#allocation5 + $0xa0] sm:$0xff]   ;;  %v2277_v22 = vld [vmem:[#allocation5 + $0x28] sm:$0xff]   ;;  %p2448_p10 = scmp.lt.s32.totalorder %s2853_s28, %s2446_s13  ;;  %p2449_p13 = scmp.lt.s32.totalorder %s2447_s24, %s2441_s25 }
  0x60   : > { %2073 = vmatpush3.bf16.msra.mxu1 %v2262_v7  ;;  %1962 = vmatprep.subr.bf16.mxu0 %v2263_v8  ;;  %v2278_v23 = vld [vmem:[#allocation5 + $0xa8] sm:$0xff]   ;;  %v2279_v24 = vld [vmem:[#allocation5 + $0x70] sm:$0xff]   ;;  %v2283_v28 = vld [vmem:[#allocation5 + $0x78] sm:$0xff]   ;;  %p2444_p8 = pneg %p2443_p6 }
  0x61   : > { %2074 = vmatprep.subr.bf16.mxu1 %v2264_v9  ;;  %v2280_v25 = vld [vmem:[#allocation5 + $0xf0] sm:$0xff]   ;;  %v2284_v29 = vld [vmem:[#allocation5 + $0xf8] sm:$0xff]   ;;  %p2450_p3 = por %p2449_p13, %p2448_p10 }
  0x62   : > { %v2281_v26 = vld [vmem:[#allocation5 + $0x30] sm:$0xff]   ;;  %v2285_v30 = vld [vmem:[#allocation5 + $0x38] sm:$0xff]  }
  0x63   : > { %1963 = vmatpush3.bf16.msra.mxu0 %v2265_v10  ;;  %v2282_v27 = vld [vmem:[#allocation5 + $0xb0] sm:$0xff]   ;;  %v2286_v31 = vld [vmem:[#allocation5 + $0xb8] sm:$0xff]   ;;  %p2451_p7 = pnand %p2450_p3, %p2444_p8 }
  0x64   : > { %2075 = vmatpush3.bf16.msra.mxu1 %v2266_v11  ;;  %1964 = vmatprep.subr.bf16.mxu0 %v2267_v12  ;;  %v2287_v32 = vld [vmem:[%s2754_s8] ss:$16 sps:$4 sm:$0xff]   ;;  %v2289_v33 = vld [vmem:[%s2754_s8 + $0x4] ss:$16 sps:$4 sm:$0xff]   ;;  %v2290_v34 = vld [vmem:[%s2754_s8 + $0x8] ss:$16 sps:$4 sm:$0xff]  }
  0x65   : > { %2076 = vmatprep.subr.bf16.mxu1 %v2268_v13  ;;  %v2292_v35 = vld [vmem:[%s2754_s8 + $0xc] ss:$16 sps:$4 sm:$0xff]   ;;  %925 = vmatprep.mubr.bf16.mxu0 %v2289_v33  ;;  %v2293_v36 = vld [vmem:[%s2754_s8 + $0x24] ss:$16 sps:$4 sm:$0xff]   ;;  %v2297_v38 = vld [vmem:[%s2754_s8 + $0x20] ss:$16 sps:$4 sm:$0xff]  }
  0x66   : > { %1086 = vmatprep.mubr.bf16.mxu1 %v2292_v35  ;;  %v2295_v37 = vld [vmem:[%s2754_s8 + $0x2c] ss:$16 sps:$4 sm:$0xff]   ;;  %v2298_v39 = vld [vmem:[%s2754_s8 + $0x28] ss:$16 sps:$4 sm:$0xff]   ;;  %v2299_v40 = vld [vmem:[%s2754_s8 + $0x44] ss:$16 sps:$4 sm:$0xff]  }
  0x67   : > { %1965 = vmatpush3.bf16.msra.mxu0 %v2269_v14  ;;  %v2301_v41 = vld [vmem:[%s2754_s8 + $0x4c] ss:$16 sps:$4 sm:$0xff]   ;;  %v2303_v42 = vld [vmem:[%s2754_s8 + $0x40] ss:$16 sps:$4 sm:$0xff]   ;;  %v2304_v43 = vld [vmem:[%s2754_s8 + $0x48] ss:$16 sps:$4 sm:$0xff]  }
  0x68   : > { %2077 = vmatpush3.bf16.msra.mxu1 %v2270_v15  ;;  %1966 = vmatprep.subr.bf16.mxu0 %v2271_v16  ;;  %v2305_v44 = vld [vmem:[%s2754_s8 + $0x64] ss:$16 sps:$4 sm:$0xff]   ;;  %v2307_v45 = vld [vmem:[%s2754_s8 + $0x6c] ss:$16 sps:$4 sm:$0xff]   ;;  %v2309_v46 = vld [vmem:[%s2754_s8 + $0x60] ss:$16 sps:$4 sm:$0xff]  }
  0x69   : > { %2078 = vmatprep.subr.bf16.mxu1 %v2272_v17  ;;  %v2310_v47 = vld [vmem:[%s2754_s8 + $0x68] ss:$16 sps:$4 sm:$0xff]   ;;  %v2311_v48 = vld [vmem:[%s2754_s8 + $0x84] ss:$16 sps:$4 sm:$0xff]   ;;  %v2313_v49 = vld [vmem:[%s2754_s8 + $0x8c] ss:$16 sps:$4 sm:$0xff]  }
  0x6a   : > { %v2315_v50 = vld [vmem:[%s2754_s8 + $0x80] ss:$16 sps:$4 sm:$0xff]   ;;  %v2316_v51 = vld [vmem:[%s2754_s8 + $0x88] ss:$16 sps:$4 sm:$0xff]   ;;  %v2317_v52 = vld [vmem:[%s2754_s8 + $0xa4] ss:$16 sps:$4 sm:$0xff]  }
  0x6b   : > { %1967 = vmatpush3.bf16.msra.mxu0 %v2273_v18  ;;  %v2319_v53 = vld [vmem:[%s2754_s8 + $0xac] ss:$16 sps:$4 sm:$0xff]   ;;  %v2321_v54 = vld [vmem:[%s2754_s8 + $0xa0] ss:$16 sps:$4 sm:$0xff]   ;;  %v2322_v55 = vld [vmem:[%s2754_s8 + $0xa8] ss:$16 sps:$4 sm:$0xff]  }
  0x6c   : > { %2079 = vmatpush3.bf16.msra.mxu1 %v2274_v19  ;;  %1968 = vmatprep.subr.bf16.mxu0 %v2275_v20  ;;  %v2323_v56 = vld [vmem:[%s2754_s8 + $0xc4] ss:$16 sps:$4 sm:$0xff]   ;;  %v2325_v57 = vld [vmem:[%s2754_s8 + $0xcc] ss:$16 sps:$4 sm:$0xff]   ;;  %v2327_v58 = vld [vmem:[%s2754_s8 + $0xc0] ss:$16 sps:$4 sm:$0xff]  }
  0x6d   : > { %2080 = vmatprep.subr.bf16.mxu1 %v2276_v21  ;;  %v2328_v59 = vld [vmem:[%s2754_s8 + $0xc8] ss:$16 sps:$4 sm:$0xff]   ;;  %v2329_v60 = vld [vmem:[%s2754_s8 + $0xe4] ss:$16 sps:$4 sm:$0xff]   ;;  %v2331_v61 = vld [vmem:[%s2754_s8 + $0xec] ss:$16 sps:$4 sm:$0xff]  }
  0x6e   : > { %v2333_v62 = vld [vmem:[%s2754_s8 + $0xe0] ss:$16 sps:$4 sm:$0xff]   ;;  %v2334_v63 = vld [vmem:[%s2754_s8 + $0xe8] ss:$16 sps:$4 sm:$0xff]   ;;  %v2335_v0 = vld [vmem:[%s2754_s8 + $0x104] ss:$16 sps:$4 sm:$0xff]  }
  0x6f   : > { %1969 = vmatpush3.bf16.msra.mxu0 %v2277_v22  ;;  %v2337_v1 = vld [vmem:[%s2754_s8 + $0x10c] ss:$16 sps:$4 sm:$0xff]   ;;  %v2339_v2 = vld [vmem:[%s2754_s8 + $0x100] ss:$16 sps:$4 sm:$0xff]   ;;  %v2340_v3 = vld [vmem:[%s2754_s8 + $0x108] ss:$16 sps:$4 sm:$0xff]  }
  0x70   : > { %2081 = vmatpush3.bf16.msra.mxu1 %v2278_v23  ;;  %1970 = vmatprep.subr.bf16.mxu0 %v2279_v24  ;;  %v2341_v4 = vld [vmem:[%s2754_s8 + $0x124] ss:$16 sps:$4 sm:$0xff]   ;;  %v2343_v5 = vld [vmem:[%s2754_s8 + $0x12c] ss:$16 sps:$4 sm:$0xff]   ;;  %v2345_v6 = vld [vmem:[%s2754_s8 + $0x120] ss:$16 sps:$4 sm:$0xff]  }
  0x71   : > { %2082 = vmatprep.subr.bf16.mxu1 %v2280_v25  ;;  %v2346_v7 = vld [vmem:[%s2754_s8 + $0x128] ss:$16 sps:$4 sm:$0xff]   ;;  %v2347_v8 = vld [vmem:[%s2754_s8 + $0x144] ss:$16 sps:$4 sm:$0xff]   ;;  %v2349_v9 = vld [vmem:[%s2754_s8 + $0x14c] ss:$16 sps:$4 sm:$0xff]  }
  0x72   : > { %v2351_v10 = vld [vmem:[%s2754_s8 + $0x140] ss:$16 sps:$4 sm:$0xff]   ;;  %v2352_v11 = vld [vmem:[%s2754_s8 + $0x148] ss:$16 sps:$4 sm:$0xff]   ;;  %v2353_v12 = vld [vmem:[%s2754_s8 + $0x164] ss:$16 sps:$4 sm:$0xff]  }
  0x73   : > { %1971 = vmatpush3.bf16.msra.mxu0 %v2281_v26  ;;  %v2355_v13 = vld [vmem:[%s2754_s8 + $0x16c] ss:$16 sps:$4 sm:$0xff]   ;;  %v2357_v14 = vld [vmem:[%s2754_s8 + $0x160] ss:$16 sps:$4 sm:$0xff]   ;;  %v2358_v15 = vld [vmem:[%s2754_s8 + $0x168] ss:$16 sps:$4 sm:$0xff]  }
  0x74   : > { %2083 = vmatpush3.bf16.msra.mxu1 %v2282_v27  ;;  %1972 = vmatprep.subr.bf16.mxu0 %v2283_v28  ;;  %v2359_v16 = vld [vmem:[%s2754_s8 + $0x184] ss:$16 sps:$4 sm:$0xff]   ;;  %v2361_v17 = vld [vmem:[%s2754_s8 + $0x18c] ss:$16 sps:$4 sm:$0xff]   ;;  %v2363_v18 = vld [vmem:[%s2754_s8 + $0x180] ss:$16 sps:$4 sm:$0xff]  }
  0x75   : > { %2084 = vmatprep.subr.bf16.mxu1 %v2284_v29  ;;  %v2364_v19 = vld [vmem:[%s2754_s8 + $0x188] ss:$16 sps:$4 sm:$0xff]   ;;  %v2365_v20 = vld [vmem:[%s2754_s8 + $0x1a4] ss:$16 sps:$4 sm:$0xff]   ;;  %v2367_v21 = vld [vmem:[%s2754_s8 + $0x1ac] ss:$16 sps:$4 sm:$0xff]  }
  0x76   : > { %v2369_v22 = vld [vmem:[%s2754_s8 + $0x1a0] ss:$16 sps:$4 sm:$0xff]   ;;  %v2370_v23 = vld [vmem:[%s2754_s8 + $0x1a8] ss:$16 sps:$4 sm:$0xff]   ;;  %v2371_v24 = vld [vmem:[%s2754_s8 + $0x1c4] ss:$16 sps:$4 sm:$0xff]  }
  0x77   : > { %1973 = vmatpush3.bf16.msra.mxu0 %v2285_v30  ;;  %v2373_v25 = vld [vmem:[%s2754_s8 + $0x1cc] ss:$16 sps:$4 sm:$0xff]   ;;  %v2375_v26 = vld [vmem:[%s2754_s8 + $0x1c0] ss:$16 sps:$4 sm:$0xff]   ;;  %v2376_v27 = vld [vmem:[%s2754_s8 + $0x1c8] ss:$16 sps:$4 sm:$0xff]  }
  0x78   : > { %2085 = vmatpush3.bf16.msra.mxu1 %v2286_v31  ;;  %v2377_v28 = vld [vmem:[%s2754_s8 + $0x1e4] ss:$16 sps:$4 sm:$0xff]   ;;  %v2379_v29 = vld [vmem:[%s2754_s8 + $0x1ec] ss:$16 sps:$4 sm:$0xff]   ;;  %v2381_v30 = vld [vmem:[%s2754_s8 + $0x1e0] ss:$16 sps:$4 sm:$0xff]  }
  0x79   : > { %v2382_v31 = vld [vmem:[%s2754_s8 + $0x1e8] ss:$16 sps:$4 sm:$0xff]  }
  0x7a   : > { %926 = vmatmul.mubr.bf16.vlgmr.msra.gmra.mrb[0].mxu0 %v2287_v32 }
  0x7b   : > { %1087 = vmatmul.mubr.bf16.vlgmr.msra.gmra.mrb[0].mxu1 %v2290_v34  ;;  %933 = vmatprep.mubr.bf16.mxu0 %v2293_v36 }
  0x7c   : > { %1094 = vmatprep.mubr.bf16.mxu1 %v2295_v37 }
  0x82   : > { %934 = vmatmul.mubr.bf16.gmra.mrb[4].mxu0 %v2297_v38 }
  0x83   : > { %1095 = vmatmul.mubr.bf16.gmra.mrb[4].mxu1 %v2298_v39  ;;  %941 = vmatprep.mubr.bf16.mxu0 %v2299_v40 }
  0x84   : > { %1102 = vmatprep.mubr.bf16.mxu1 %v2301_v41 }
  0x8a   : > { %942 = vmatmul.mubr.bf16.gmra.mrb[8].mxu0 %v2303_v42 }
  0x8b   : > { %1103 = vmatmul.mubr.bf16.gmra.mrb[8].mxu1 %v2304_v43  ;;  %949 = vmatprep.mubr.bf16.mxu0 %v2305_v44 }
  0x8c   : > { %1110 = vmatprep.mubr.bf16.mxu1 %v2307_v45 }
  0x92   : > { %950 = vmatmul.mubr.bf16.gmra.mrb[12].mxu0 %v2309_v46 }
  0x93   : > { %1111 = vmatmul.mubr.bf16.gmra.mrb[12].mxu1 %v2310_v47  ;;  %957 = vmatprep.mubr.bf16.mxu0 %v2311_v48 }
  0x94   : > { %1118 = vmatprep.mubr.bf16.mxu1 %v2313_v49 }
  0x9a   : > { %958 = vmatmul.mubr.bf16.gmra.mrb[16].mxu0 %v2315_v50 }
  0x9b   : > { %1119 = vmatmul.mubr.bf16.gmra.mrb[16].mxu1 %v2316_v51  ;;  %965 = vmatprep.mubr.bf16.mxu0 %v2317_v52 }
  0x9c   : > { %1126 = vmatprep.mubr.bf16.mxu1 %v2319_v53 }
  0xa2   : > { %966 = vmatmul.mubr.bf16.gmra.mrb[20].mxu0 %v2321_v54 }
  0xa3   : > { %1127 = vmatmul.mubr.bf16.gmra.mrb[20].mxu1 %v2322_v55  ;;  %973 = vmatprep.mubr.bf16.mxu0 %v2323_v56 }
  0xa4   : > { %1134 = vmatprep.mubr.bf16.mxu1 %v2325_v57 }
  0xaa   : > { %974 = vmatmul.mubr.bf16.gmra.mrb[24].mxu0 %v2327_v58 }
  0xab   : > { %1135 = vmatmul.mubr.bf16.gmra.mrb[24].mxu1 %v2328_v59  ;;  %981 = vmatprep.mubr.bf16.mxu0 %v2329_v60 }
  0xac   : > { %1142 = vmatprep.mubr.bf16.mxu1 %v2331_v61 }
  0xb2   : > { %982 = vmatmul.mubr.bf16.gmra.mrb[28].mxu0 %v2333_v62 }
  0xb3   : > { %1143 = vmatmul.mubr.bf16.gmra.mrb[28].mxu1 %v2334_v63  ;;  %989 = vmatprep.mubr.bf16.mxu0 %v2335_v0 }
  0xb4   : > { %1150 = vmatprep.mubr.bf16.mxu1 %v2337_v1 }
  0xba   : > { %990 = vmatmul.mubr.bf16.gmra.mrb[32].mxu0 %v2339_v2 }
  0xbb   : > { %1151 = vmatmul.mubr.bf16.gmra.mrb[32].mxu1 %v2340_v3  ;;  %997 = vmatprep.mubr.bf16.mxu0 %v2341_v4 }
  0xbc   : > { %1158 = vmatprep.mubr.bf16.mxu1 %v2343_v5 }
  0xc2   : > { %998 = vmatmul.mubr.bf16.gmra.mrb[36].mxu0 %v2345_v6 }
  0xc3   : > { %1159 = vmatmul.mubr.bf16.gmra.mrb[36].mxu1 %v2346_v7  ;;  %1005 = vmatprep.mubr.bf16.mxu0 %v2347_v8 }
  0xc4   : > { %1166 = vmatprep.mubr.bf16.mxu1 %v2349_v9 }
  0xca   : > { %1006 = vmatmul.mubr.bf16.gmra.mrb[40].mxu0 %v2351_v10 }
  0xcb   : > { %1167 = vmatmul.mubr.bf16.gmra.mrb[40].mxu1 %v2352_v11  ;;  %1013 = vmatprep.mubr.bf16.mxu0 %v2353_v12 }
  0xcc   : > { %1174 = vmatprep.mubr.bf16.mxu1 %v2355_v13 }
  0xd2   : > { %1014 = vmatmul.mubr.bf16.gmra.mrb[44].mxu0 %v2357_v14 }
  0xd3   : > { %1175 = vmatmul.mubr.bf16.gmra.mrb[44].mxu1 %v2358_v15  ;;  %1021 = vmatprep.mubr.bf16.mxu0 %v2359_v16 }
  0xd4   : > { %1182 = vmatprep.mubr.bf16.mxu1 %v2361_v17 }
  0xda   : > { %1022 = vmatmul.mubr.bf16.gmra.mrb[48].mxu0 %v2363_v18 }
  0xdb   : > { %1183 = vmatmul.mubr.bf16.gmra.mrb[48].mxu1 %v2364_v19  ;;  %1029 = vmatprep.mubr.bf16.mxu0 %v2365_v20 }
  0xdc   : > { %1190 = vmatprep.mubr.bf16.mxu1 %v2367_v21 }
  0xe2   : > { %1030 = vmatmul.mubr.bf16.gmra.mrb[52].mxu0 %v2369_v22 }
  0xe3   : > { %1191 = vmatmul.mubr.bf16.gmra.mrb[52].mxu1 %v2370_v23  ;;  %1037 = vmatprep.mubr.bf16.mxu0 %v2371_v24 }
  0xe4   : > { %1198 = vmatprep.mubr.bf16.mxu1 %v2373_v25 }
  0xea   : > { %1038 = vmatmul.mubr.bf16.gmra.mrb[56].mxu0 %v2375_v26 }
  0xeb   : > { %1199 = vmatmul.mubr.bf16.gmra.mrb[56].mxu1 %v2376_v27  ;;  %1045 = vmatprep.mubr.bf16.mxu0 %v2377_v28 }
  0xec   : > { %1206 = vmatprep.mubr.bf16.mxu1 %v2379_v29 }
  0xf2   : > { %1046 = vmatmul.mubr.bf16.gmra.mrb[60].mxu0 %v2381_v30 }
  0xf3   : > { %1207 = vmatmul.mubr.bf16.gmra.mrb[60].mxu1 %v2382_v31 }
 0x14d   : > { %v1974_v32 = vpop.f32.mrb[0].mxu0 }
 0x14e   : > { %v2086_v33 = vpop.f32.mrb[0].mxu1  ;;  %v1975_v34 = vpop.f32.mrb[1].mxu0 }
 0x14f   : > { %v1976_v35 = vadd.f32 %v1975_v34, %v1974_v32  ;;  %v2087_v36 = vpop.f32.mrb[1].mxu1  ;;  %v1977_v37 = vpop.f32.mrb[2].mxu0 }
 0x150   : > { %v2088_v38 = vadd.f32 %v2087_v36, %v2086_v33  ;;  %v2089_v39 = vpop.f32.mrb[2].mxu1  ;;  %v1978_v40 = vpop.f32.mrb[3].mxu0 }
 0x151   : > { %v1979_v41 = vadd.f32 %v1978_v40, %v1977_v37  ;;  %v2090_v42 = vpop.f32.mrb[3].mxu1 }
 0x152   : > { %v1089_v43 = vadd.f32 %v2088_v38, %v1976_v35  ;;  %v2091_v44 = vadd.f32 %v2090_v42, %v2089_v39 }
 0x154   : > { %v1092_v45 = vadd.f32 %v2091_v44, %v1979_v41  ;;  %v1412_v47 = vmul.f32 %v1089_v43, %v1089_v43 }
 0x155   : > { %v1980_v46 = vpop.f32.mrb[4].mxu0 }
 0x156   : > { %v1866_v48 = vpack.c.bf16 %v1092_v45, %v1089_v43  ;;  %v1375_v49 = vadd.f32 %v1092_v45, %v1089_v43  ;;  %v1413_v50 = vmul.f32 %v1092_v45, %v1092_v45  ;;  %v2092_v51 = vpop.f32.mrb[4].mxu1  ;;  %v1981_v52 = vpop.f32.mrb[5].mxu0 }
 0x157   : > { %v1982_v53 = vadd.f32 %v1981_v52, %v1980_v46  ;;  %v2093_v54 = vpop.f32.mrb[5].mxu1  ;;  %v1983_v55 = vpop.f32.mrb[6].mxu0 }
 0x158   : > { %1867 = vst [vmem:[%s2829_s23] sm:$0xff] %v1866_v48   ;;  %v1444_v56 = vadd.f32 %v1413_v50, %v1412_v47  ;;  %v2094_v57 = vadd.f32 %v2093_v54, %v2092_v51  ;;  %v2095_v58 = vpop.f32.mrb[6].mxu1  ;;  %v1984_v59 = vpop.f32.mrb[7].mxu0 }
 0x159   : > { %v1985_v60 = vadd.f32 %v1984_v59, %v1983_v55  ;;  %v2096_v61 = vpop.f32.mrb[7].mxu1 }
 0x15a   : > { %v1097_v62 = vadd.f32 %v2094_v57, %v1982_v53  ;;  %v2097_v63 = vadd.f32 %v2096_v61, %v2095_v58 }
 0x15c   : > { %v1376_v0 = vadd.f32 %v1375_v49, %v1097_v62  ;;  %v1414_v1 = vmul.f32 %v1097_v62, %v1097_v62  ;;  %v1100_v2 = vadd.f32 %v2097_v63, %v1985_v60 }
 0x15d   : > { %v1986_v3 = vpop.f32.mrb[8].mxu0 }
 0x15e   : > { %v1445_v4 = vadd.f32 %v1444_v56, %v1414_v1  ;;  %v1871_v5 = vpack.c.bf16 %v1100_v2, %v1097_v62  ;;  %v1377_v6 = vadd.f32 %v1376_v0, %v1100_v2  ;;  %v1415_v7 = vmul.f32 %v1100_v2, %v1100_v2  ;;  %v2098_v8 = vpop.f32.mrb[8].mxu1  ;;  %v1987_v9 = vpop.f32.mrb[9].mxu0 }
 0x15f   : > { %v1988_v10 = vadd.f32 %v1987_v9, %v1986_v3  ;;  %v2099_v11 = vpop.f32.mrb[9].mxu1  ;;  %v1989_v12 = vpop.f32.mrb[10].mxu0 }
 0x160   : > { %1943 = vst [vmem:[%s2829_s23 + $0x8] sm:$0xff] %v1871_v5   ;;  %v1446_v13 = vadd.f32 %v1445_v4, %v1415_v7  ;;  %v2100_v14 = vadd.f32 %v2099_v11, %v2098_v8  ;;  %v2101_v15 = vpop.f32.mrb[10].mxu1  ;;  %v1990_v16 = vpop.f32.mrb[11].mxu0 }
 0x161   : > { %v1991_v17 = vadd.f32 %v1990_v16, %v1989_v12  ;;  %v2102_v18 = vpop.f32.mrb[11].mxu1 }
 0x162   : > { %v1105_v19 = vadd.f32 %v2100_v14, %v1988_v10  ;;  %v2103_v20 = vadd.f32 %v2102_v18, %v2101_v15 }
 0x164   : > { %v1378_v21 = vadd.f32 %v1377_v6, %v1105_v19  ;;  %v1416_v22 = vmul.f32 %v1105_v19, %v1105_v19  ;;  %v1108_v23 = vadd.f32 %v2103_v20, %v1991_v17 }
 0x165   : > { %v1992_v24 = vpop.f32.mrb[12].mxu0 }
 0x166   : > { %v1447_v25 = vadd.f32 %v1446_v13, %v1416_v22  ;;  %v1876_v26 = vpack.c.bf16 %v1108_v23, %v1105_v19  ;;  %v1379_v27 = vadd.f32 %v1378_v21, %v1108_v23  ;;  %v1417_v28 = vmul.f32 %v1108_v23, %v1108_v23  ;;  %v2104_v29 = vpop.f32.mrb[12].mxu1  ;;  %v1993_v30 = vpop.f32.mrb[13].mxu0 }
 0x167   : > { %v1994_v31 = vadd.f32 %v1993_v30, %v1992_v24  ;;  %v2105_v32 = vpop.f32.mrb[13].mxu1  ;;  %v1995_v33 = vpop.f32.mrb[14].mxu0 }
 0x168   : > { %1944 = vst [vmem:[%s2829_s23 + $0x10] sm:$0xff] %v1876_v26   ;;  %v1448_v34 = vadd.f32 %v1447_v25, %v1417_v28  ;;  %v2106_v35 = vadd.f32 %v2105_v32, %v2104_v29  ;;  %v2107_v36 = vpop.f32.mrb[14].mxu1  ;;  %v1996_v37 = vpop.f32.mrb[15].mxu0 }
 0x169   : > { %v1997_v38 = vadd.f32 %v1996_v37, %v1995_v33  ;;  %v2108_v39 = vpop.f32.mrb[15].mxu1 }
 0x16a   : > { %v1113_v40 = vadd.f32 %v2106_v35, %v1994_v31  ;;  %v2109_v41 = vadd.f32 %v2108_v39, %v2107_v36 }
 0x16c   : > { %v1380_v42 = vadd.f32 %v1379_v27, %v1113_v40  ;;  %v1418_v43 = vmul.f32 %v1113_v40, %v1113_v40  ;;  %v1116_v44 = vadd.f32 %v2109_v41, %v1997_v38 }
 0x16d   : > { %v1998_v45 = vpop.f32.mrb[16].mxu0 }
 0x16e   : > { %v1449_v46 = vadd.f32 %v1448_v34, %v1418_v43  ;;  %v1881_v47 = vpack.c.bf16 %v1116_v44, %v1113_v40  ;;  %v1381_v48 = vadd.f32 %v1380_v42, %v1116_v44  ;;  %v1419_v49 = vmul.f32 %v1116_v44, %v1116_v44  ;;  %v2110_v50 = vpop.f32.mrb[16].mxu1  ;;  %v1999_v51 = vpop.f32.mrb[17].mxu0 }
 0x16f   : > { %v2000_v52 = vadd.f32 %v1999_v51, %v1998_v45  ;;  %v2111_v53 = vpop.f32.mrb[17].mxu1  ;;  %v2001_v54 = vpop.f32.mrb[18].mxu0 }
 0x170   : > { %1945 = vst [vmem:[%s2829_s23 + $0x18] sm:$0xff] %v1881_v47   ;;  %v1450_v55 = vadd.f32 %v1449_v46, %v1419_v49  ;;  %v2112_v56 = vadd.f32 %v2111_v53, %v2110_v50  ;;  %v2113_v57 = vpop.f32.mrb[18].mxu1  ;;  %v2002_v58 = vpop.f32.mrb[19].mxu0 }
 0x171   : > { %v2003_v59 = vadd.f32 %v2002_v58, %v2001_v54  ;;  %v2114_v60 = vpop.f32.mrb[19].mxu1 }
 0x172   : > { %v1121_v61 = vadd.f32 %v2112_v56, %v2000_v52  ;;  %v2115_v62 = vadd.f32 %v2114_v60, %v2113_v57 }
 0x174   : > { %v1382_v63 = vadd.f32 %v1381_v48, %v1121_v61  ;;  %v1420_v0 = vmul.f32 %v1121_v61, %v1121_v61  ;;  %v1124_v1 = vadd.f32 %v2115_v62, %v2003_v59 }
 0x175   : > { %v2004_v2 = vpop.f32.mrb[20].mxu0 }
 0x176   : > { %v1451_v3 = vadd.f32 %v1450_v55, %v1420_v0  ;;  %v1886_v4 = vpack.c.bf16 %v1124_v1, %v1121_v61  ;;  %v1383_v5 = vadd.f32 %v1382_v63, %v1124_v1  ;;  %v1421_v6 = vmul.f32 %v1124_v1, %v1124_v1  ;;  %v2116_v7 = vpop.f32.mrb[20].mxu1  ;;  %v2005_v8 = vpop.f32.mrb[21].mxu0 }
 0x177   : > { %v2006_v9 = vadd.f32 %v2005_v8, %v2004_v2  ;;  %v2117_v10 = vpop.f32.mrb[21].mxu1  ;;  %v2007_v11 = vpop.f32.mrb[22].mxu0 }
 0x178   : > { %1946 = vst [vmem:[%s2829_s23 + $0x20] sm:$0xff] %v1886_v4   ;;  %v1452_v12 = vadd.f32 %v1451_v3, %v1421_v6  ;;  %v2118_v13 = vadd.f32 %v2117_v10, %v2116_v7  ;;  %v2119_v14 = vpop.f32.mrb[22].mxu1  ;;  %v2008_v15 = vpop.f32.mrb[23].mxu0 }
 0x179   : > { %v2009_v16 = vadd.f32 %v2008_v15, %v2007_v11  ;;  %v2120_v17 = vpop.f32.mrb[23].mxu1 }
 0x17a   : > { %v1129_v18 = vadd.f32 %v2118_v13, %v2006_v9  ;;  %v2121_v19 = vadd.f32 %v2120_v17, %v2119_v14 }
 0x17c   : > { %v1384_v20 = vadd.f32 %v1383_v5, %v1129_v18  ;;  %v1422_v21 = vmul.f32 %v1129_v18, %v1129_v18  ;;  %v1132_v22 = vadd.f32 %v2121_v19, %v2009_v16 }
 0x17d   : > { %v2010_v23 = vpop.f32.mrb[24].mxu0 }
 0x17e   : > { %v1453_v24 = vadd.f32 %v1452_v12, %v1422_v21  ;;  %v1891_v25 = vpack.c.bf16 %v1132_v22, %v1129_v18  ;;  %v1385_v26 = vadd.f32 %v1384_v20, %v1132_v22  ;;  %v1423_v27 = vmul.f32 %v1132_v22, %v1132_v22  ;;  %v2122_v28 = vpop.f32.mrb[24].mxu1  ;;  %v2011_v29 = vpop.f32.mrb[25].mxu0 }
 0x17f   : > { %v2012_v30 = vadd.f32 %v2011_v29, %v2010_v23  ;;  %v2123_v31 = vpop.f32.mrb[25].mxu1  ;;  %v2013_v32 = vpop.f32.mrb[26].mxu0 }
 0x180   : > { %1947 = vst [vmem:[%s2829_s23 + $0x28] sm:$0xff] %v1891_v25   ;;  %v1454_v33 = vadd.f32 %v1453_v24, %v1423_v27  ;;  %v2124_v34 = vadd.f32 %v2123_v31, %v2122_v28  ;;  %v2125_v35 = vpop.f32.mrb[26].mxu1  ;;  %v2014_v36 = vpop.f32.mrb[27].mxu0 }
 0x181   : > { %v2015_v37 = vadd.f32 %v2014_v36, %v2013_v32  ;;  %v2126_v38 = vpop.f32.mrb[27].mxu1 }
 0x182   : > { %v1137_v39 = vadd.f32 %v2124_v34, %v2012_v30  ;;  %v2127_v40 = vadd.f32 %v2126_v38, %v2125_v35 }
 0x184   : > { %v1386_v41 = vadd.f32 %v1385_v26, %v1137_v39  ;;  %v1424_v42 = vmul.f32 %v1137_v39, %v1137_v39  ;;  %v1140_v43 = vadd.f32 %v2127_v40, %v2015_v37 }
 0x185   : > { %v2016_v44 = vpop.f32.mrb[28].mxu0 }
 0x186   : > { %v1455_v45 = vadd.f32 %v1454_v33, %v1424_v42  ;;  %v1896_v46 = vpack.c.bf16 %v1140_v43, %v1137_v39  ;;  %v1387_v47 = vadd.f32 %v1386_v41, %v1140_v43  ;;  %v1425_v48 = vmul.f32 %v1140_v43, %v1140_v43  ;;  %v2128_v49 = vpop.f32.mrb[28].mxu1  ;;  %v2017_v50 = vpop.f32.mrb[29].mxu0 }
 0x187   : > { %v2018_v51 = vadd.f32 %v2017_v50, %v2016_v44  ;;  %v2129_v52 = vpop.f32.mrb[29].mxu1  ;;  %v2019_v53 = vpop.f32.mrb[30].mxu0 }
 0x188   : > { %1948 = vst [vmem:[%s2829_s23 + $0x30] sm:$0xff] %v1896_v46   ;;  %v1456_v54 = vadd.f32 %v1455_v45, %v1425_v48  ;;  %v2130_v55 = vadd.f32 %v2129_v52, %v2128_v49  ;;  %v2131_v56 = vpop.f32.mrb[30].mxu1  ;;  %v2020_v57 = vpop.f32.mrb[31].mxu0 }
 0x189   : > { %v2021_v58 = vadd.f32 %v2020_v57, %v2019_v53  ;;  %v2132_v59 = vpop.f32.mrb[31].mxu1 }
 0x18a   : > { %v1145_v60 = vadd.f32 %v2130_v55, %v2018_v51  ;;  %v2133_v61 = vadd.f32 %v2132_v59, %v2131_v56 }
 0x18c   : > { %v1388_v62 = vadd.f32 %v1387_v47, %v1145_v60  ;;  %v1426_v63 = vmul.f32 %v1145_v60, %v1145_v60  ;;  %v1148_v0 = vadd.f32 %v2133_v61, %v2021_v58 }
 0x18d   : > { %v2022_v1 = vpop.f32.mrb[32].mxu0 }
 0x18e   : > { %v1457_v2 = vadd.f32 %v1456_v54, %v1426_v63  ;;  %v1901_v3 = vpack.c.bf16 %v1148_v0, %v1145_v60  ;;  %v1389_v4 = vadd.f32 %v1388_v62, %v1148_v0  ;;  %v1427_v5 = vmul.f32 %v1148_v0, %v1148_v0  ;;  %v2134_v6 = vpop.f32.mrb[32].mxu1  ;;  %v2023_v7 = vpop.f32.mrb[33].mxu0 }
 0x18f   : > { %v2024_v8 = vadd.f32 %v2023_v7, %v2022_v1  ;;  %v2135_v9 = vpop.f32.mrb[33].mxu1  ;;  %v2025_v10 = vpop.f32.mrb[34].mxu0 }
 0x190   : > { %1949 = vst [vmem:[%s2829_s23 + $0x38] sm:$0xff] %v1901_v3   ;;  %v1458_v11 = vadd.f32 %v1457_v2, %v1427_v5  ;;  %v2136_v12 = vadd.f32 %v2135_v9, %v2134_v6  ;;  %v2137_v13 = vpop.f32.mrb[34].mxu1  ;;  %v2026_v14 = vpop.f32.mrb[35].mxu0 }
 0x191   : > { %v2027_v15 = vadd.f32 %v2026_v14, %v2025_v10  ;;  %v2138_v16 = vpop.f32.mrb[35].mxu1 }
 0x192   : > { %v1153_v17 = vadd.f32 %v2136_v12, %v2024_v8  ;;  %v2139_v18 = vadd.f32 %v2138_v16, %v2137_v13 }
 0x194   : > { %v1390_v19 = vadd.f32 %v1389_v4, %v1153_v17  ;;  %v1428_v20 = vmul.f32 %v1153_v17, %v1153_v17  ;;  %v1156_v21 = vadd.f32 %v2139_v18, %v2027_v15 }
 0x195   : > { %v2028_v22 = vpop.f32.mrb[36].mxu0 }
 0x196   : > { %v1459_v23 = vadd.f32 %v1458_v11, %v1428_v20  ;;  %v1906_v24 = vpack.c.bf16 %v1156_v21, %v1153_v17  ;;  %v1391_v25 = vadd.f32 %v1390_v19, %v1156_v21  ;;  %v1429_v26 = vmul.f32 %v1156_v21, %v1156_v21  ;;  %v2140_v27 = vpop.f32.mrb[36].mxu1  ;;  %v2029_v28 = vpop.f32.mrb[37].mxu0 }
 0x197   : > { %v2030_v29 = vadd.f32 %v2029_v28, %v2028_v22  ;;  %v2141_v30 = vpop.f32.mrb[37].mxu1  ;;  %v2031_v31 = vpop.f32.mrb[38].mxu0 }
 0x198   : > { %1950 = vst [vmem:[%s2829_s23 + $0x40] sm:$0xff] %v1906_v24   ;;  %v1460_v32 = vadd.f32 %v1459_v23, %v1429_v26  ;;  %v2142_v33 = vadd.f32 %v2141_v30, %v2140_v27  ;;  %v2143_v34 = vpop.f32.mrb[38].mxu1  ;;  %v2032_v35 = vpop.f32.mrb[39].mxu0 }
 0x199   : > { %v2033_v36 = vadd.f32 %v2032_v35, %v2031_v31  ;;  %v2144_v37 = vpop.f32.mrb[39].mxu1 }
 0x19a   : > { %v1161_v38 = vadd.f32 %v2142_v33, %v2030_v29  ;;  %v2145_v39 = vadd.f32 %v2144_v37, %v2143_v34 }
 0x19c   : > { %v1392_v40 = vadd.f32 %v1391_v25, %v1161_v38  ;;  %v1430_v41 = vmul.f32 %v1161_v38, %v1161_v38  ;;  %v1164_v42 = vadd.f32 %v2145_v39, %v2033_v36 }
 0x19d   : > { %v2034_v43 = vpop.f32.mrb[40].mxu0 }
 0x19e   : > { %v1461_v44 = vadd.f32 %v1460_v32, %v1430_v41  ;;  %v1911_v45 = vpack.c.bf16 %v1164_v42, %v1161_v38  ;;  %v1393_v46 = vadd.f32 %v1392_v40, %v1164_v42  ;;  %v1431_v47 = vmul.f32 %v1164_v42, %v1164_v42  ;;  %v2146_v48 = vpop.f32.mrb[40].mxu1  ;;  %v2035_v49 = vpop.f32.mrb[41].mxu0 }
 0x19f   : > { %v2036_v50 = vadd.f32 %v2035_v49, %v2034_v43  ;;  %v2147_v51 = vpop.f32.mrb[41].mxu1  ;;  %v2037_v52 = vpop.f32.mrb[42].mxu0 }
 0x1a0   : > { %1951 = vst [vmem:[%s2829_s23 + $0x48] sm:$0xff] %v1911_v45   ;;  %v1462_v53 = vadd.f32 %v1461_v44, %v1431_v47  ;;  %v2148_v54 = vadd.f32 %v2147_v51, %v2146_v48  ;;  %v2149_v55 = vpop.f32.mrb[42].mxu1  ;;  %v2038_v56 = vpop.f32.mrb[43].mxu0 }
 0x1a1   : > { %v2039_v57 = vadd.f32 %v2038_v56, %v2037_v52  ;;  %v2150_v58 = vpop.f32.mrb[43].mxu1 }
 0x1a2   : > { %v1169_v59 = vadd.f32 %v2148_v54, %v2036_v50  ;;  %v2151_v60 = vadd.f32 %v2150_v58, %v2149_v55 }
 0x1a4   : > { %v1394_v61 = vadd.f32 %v1393_v46, %v1169_v59  ;;  %v1432_v62 = vmul.f32 %v1169_v59, %v1169_v59  ;;  %v1172_v63 = vadd.f32 %v2151_v60, %v2039_v57 }
 0x1a5   : > { %v2040_v0 = vpop.f32.mrb[44].mxu0 }
 0x1a6   : > { %v1463_v1 = vadd.f32 %v1462_v53, %v1432_v62  ;;  %v1916_v2 = vpack.c.bf16 %v1172_v63, %v1169_v59  ;;  %v1395_v3 = vadd.f32 %v1394_v61, %v1172_v63  ;;  %v1433_v4 = vmul.f32 %v1172_v63, %v1172_v63  ;;  %v2152_v5 = vpop.f32.mrb[44].mxu1  ;;  %v2041_v6 = vpop.f32.mrb[45].mxu0 }
 0x1a7   : > { %v2042_v7 = vadd.f32 %v2041_v6, %v2040_v0  ;;  %v2153_v8 = vpop.f32.mrb[45].mxu1  ;;  %v2043_v9 = vpop.f32.mrb[46].mxu0 }
 0x1a8   : > { %1952 = vst [vmem:[%s2829_s23 + $0x50] sm:$0xff] %v1916_v2   ;;  %v1464_v10 = vadd.f32 %v1463_v1, %v1433_v4  ;;  %v2154_v11 = vadd.f32 %v2153_v8, %v2152_v5  ;;  %v2155_v12 = vpop.f32.mrb[46].mxu1  ;;  %v2044_v13 = vpop.f32.mrb[47].mxu0 }
 0x1a9   : > { %v2045_v14 = vadd.f32 %v2044_v13, %v2043_v9  ;;  %v2156_v15 = vpop.f32.mrb[47].mxu1 }
 0x1aa   : > { %v1177_v16 = vadd.f32 %v2154_v11, %v2042_v7  ;;  %v2157_v17 = vadd.f32 %v2156_v15, %v2155_v12 }
 0x1ac   : > { %v1396_v18 = vadd.f32 %v1395_v3, %v1177_v16  ;;  %v1434_v19 = vmul.f32 %v1177_v16, %v1177_v16  ;;  %v1180_v20 = vadd.f32 %v2157_v17, %v2045_v14 }
 0x1ad   : > { %v2046_v21 = vpop.f32.mrb[48].mxu0 }
 0x1ae   : > { %v1465_v22 = vadd.f32 %v1464_v10, %v1434_v19  ;;  %v1921_v23 = vpack.c.bf16 %v1180_v20, %v1177_v16  ;;  %v1397_v24 = vadd.f32 %v1396_v18, %v1180_v20  ;;  %v1435_v25 = vmul.f32 %v1180_v20, %v1180_v20  ;;  %v2158_v26 = vpop.f32.mrb[48].mxu1  ;;  %v2047_v27 = vpop.f32.mrb[49].mxu0 }
 0x1af   : > { %v2048_v28 = vadd.f32 %v2047_v27, %v2046_v21  ;;  %v2159_v29 = vpop.f32.mrb[49].mxu1  ;;  %v2049_v30 = vpop.f32.mrb[50].mxu0 }
 0x1b0   : > { %1953 = vst [vmem:[%s2829_s23 + $0x58] sm:$0xff] %v1921_v23   ;;  %v1466_v31 = vadd.f32 %v1465_v22, %v1435_v25  ;;  %v2160_v32 = vadd.f32 %v2159_v29, %v2158_v26  ;;  %v2161_v33 = vpop.f32.mrb[50].mxu1  ;;  %v2050_v34 = vpop.f32.mrb[51].mxu0 }
 0x1b1   : > { %v2051_v35 = vadd.f32 %v2050_v34, %v2049_v30  ;;  %v2162_v36 = vpop.f32.mrb[51].mxu1 }
 0x1b2   : > { %v1185_v37 = vadd.f32 %v2160_v32, %v2048_v28  ;;  %v2163_v38 = vadd.f32 %v2162_v36, %v2161_v33 }
 0x1b4   : > { %v1398_v39 = vadd.f32 %v1397_v24, %v1185_v37  ;;  %v1436_v40 = vmul.f32 %v1185_v37, %v1185_v37  ;;  %v1188_v41 = vadd.f32 %v2163_v38, %v2051_v35 }
 0x1b5   : > { %v2052_v42 = vpop.f32.mrb[52].mxu0 }
 0x1b6   : > { %v1467_v43 = vadd.f32 %v1466_v31, %v1436_v40  ;;  %v1926_v44 = vpack.c.bf16 %v1188_v41, %v1185_v37  ;;  %v1399_v45 = vadd.f32 %v1398_v39, %v1188_v41  ;;  %v1437_v46 = vmul.f32 %v1188_v41, %v1188_v41  ;;  %v2164_v47 = vpop.f32.mrb[52].mxu1  ;;  %v2053_v48 = vpop.f32.mrb[53].mxu0 }
 0x1b7   : > { %v2054_v49 = vadd.f32 %v2053_v48, %v2052_v42  ;;  %v2165_v50 = vpop.f32.mrb[53].mxu1  ;;  %v2055_v51 = vpop.f32.mrb[54].mxu0 }
 0x1b8   : > { %1954 = vst [vmem:[%s2829_s23 + $0x60] sm:$0xff] %v1926_v44   ;;  %v1468_v52 = vadd.f32 %v1467_v43, %v1437_v46  ;;  %v2166_v53 = vadd.f32 %v2165_v50, %v2164_v47  ;;  %v2167_v54 = vpop.f32.mrb[54].mxu1  ;;  %v2056_v55 = vpop.f32.mrb[55].mxu0 }
 0x1b9   : > { %v2057_v56 = vadd.f32 %v2056_v55, %v2055_v51  ;;  %v2168_v57 = vpop.f32.mrb[55].mxu1 }
 0x1ba   : > { %v1193_v58 = vadd.f32 %v2166_v53, %v2054_v49  ;;  %v2169_v59 = vadd.f32 %v2168_v57, %v2167_v54 }
 0x1bc   : > { %v1400_v60 = vadd.f32 %v1399_v45, %v1193_v58  ;;  %v1438_v61 = vmul.f32 %v1193_v58, %v1193_v58  ;;  %v1196_v62 = vadd.f32 %v2169_v59, %v2057_v56 }
 0x1bd   : > { %v2058_v63 = vpop.f32.mrb[56].mxu0 }
 0x1be   : > { %v1469_v0 = vadd.f32 %v1468_v52, %v1438_v61  ;;  %v1931_v1 = vpack.c.bf16 %v1196_v62, %v1193_v58  ;;  %v1401_v2 = vadd.f32 %v1400_v60, %v1196_v62  ;;  %v1439_v3 = vmul.f32 %v1196_v62, %v1196_v62  ;;  %v2170_v4 = vpop.f32.mrb[56].mxu1  ;;  %v2059_v5 = vpop.f32.mrb[57].mxu0 }
 0x1bf   : > { %v2060_v6 = vadd.f32 %v2059_v5, %v2058_v63  ;;  %v2171_v7 = vpop.f32.mrb[57].mxu1  ;;  %v2061_v8 = vpop.f32.mrb[58].mxu0 }
 0x1c0   : > { %1955 = vst [vmem:[%s2829_s23 + $0x68] sm:$0xff] %v1931_v1   ;;  %v1470_v9 = vadd.f32 %v1469_v0, %v1439_v3  ;;  %v2172_v10 = vadd.f32 %v2171_v7, %v2170_v4  ;;  %v2173_v11 = vpop.f32.mrb[58].mxu1  ;;  %v2062_v12 = vpop.f32.mrb[59].mxu0 }
 0x1c1   : > { %v2063_v13 = vadd.f32 %v2062_v12, %v2061_v8  ;;  %v2174_v14 = vpop.f32.mrb[59].mxu1 }
 0x1c2   : > { %v1201_v15 = vadd.f32 %v2172_v10, %v2060_v6  ;;  %v2175_v16 = vadd.f32 %v2174_v14, %v2173_v11 }
 0x1c4   : > { %v1402_v17 = vadd.f32 %v1401_v2, %v1201_v15  ;;  %v1440_v18 = vmul.f32 %v1201_v15, %v1201_v15  ;;  %v1204_v19 = vadd.f32 %v2175_v16, %v2063_v13 }
 0x1c5   : > { %v2064_v20 = vpop.f32.mrb[60].mxu0 }
 0x1c6   : > { %v1471_v21 = vadd.f32 %v1470_v9, %v1440_v18  ;;  %v1936_v22 = vpack.c.bf16 %v1204_v19, %v1201_v15  ;;  %v1403_v23 = vadd.f32 %v1402_v17, %v1204_v19  ;;  %v1441_v24 = vmul.f32 %v1204_v19, %v1204_v19  ;;  %v2176_v25 = vpop.f32.mrb[60].mxu1  ;;  %v2065_v26 = vpop.f32.mrb[61].mxu0 }
 0x1c7   : > { %v2066_v27 = vadd.f32 %v2065_v26, %v2064_v20  ;;  %v2177_v28 = vpop.f32.mrb[61].mxu1  ;;  %v2067_v29 = vpop.f32.mrb[62].mxu0 }
 0x1c8   : > { %1956 = vst [vmem:[%s2829_s23 + $0x70] sm:$0xff] %v1936_v22   ;;  %v1472_v30 = vadd.f32 %v1471_v21, %v1441_v24  ;;  %v2178_v31 = vadd.f32 %v2177_v28, %v2176_v25  ;;  %v2179_v32 = vpop.f32.mrb[62].mxu1  ;;  %v2068_v33 = vpop.f32.mrb[63].mxu0 }
 0x1c9   : > { %v2069_v34 = vadd.f32 %v2068_v33, %v2067_v29  ;;  %v2180_v35 = vpop.f32.mrb[63].mxu1 }
 0x1ca   : > { %v1209_v36 = vadd.f32 %v2178_v31, %v2066_v27  ;;  %v2181_v37 = vadd.f32 %v2180_v35, %v2179_v32 }
 0x1cc   : > { %v1404_v38 = vadd.f32 %v1403_v23, %v1209_v36  ;;  %v1442_v39 = vmul.f32 %v1209_v36, %v1209_v36  ;;  %v1212_v40 = vadd.f32 %v2181_v37, %v2069_v34 }
 0x1ce   : > { %v1473_v41 = vadd.f32 %v1472_v30, %v1442_v39  ;;  %v1941_v42 = vpack.c.bf16 %v1212_v40, %v1209_v36  ;;  %v1405_v43 = vadd.f32 %v1404_v38, %v1212_v40  ;;  %v1443_v44 = vmul.f32 %v1212_v40, %v1212_v40 }
 0x1d0   : > { %1957 = vst [vmem:[%s2829_s23 + $0x78] sm:$0xff] %v1941_v42   ;;  %v1406_v45 = vrot.slane %v1405_v43, 4  ;;  %v1474_v46 = vadd.f32 %v1473_v41, %v1443_v44 }
 0x1d1   : > { %2454 = shalt.err (!%p2451_p7)
}
 0x1d2   : > { %s2455_s7 = scalar_lea.hbm %s2851_s6, 2048  ;;  %s2459_s23 = scalar_lea.hbm %s2973_s2, 4096 }
 0x1d3   : > { %p2456_p9 = scmp.ne.s32.totalorder %s2851_s6, %s2455_s7  ;;  %p2460_p5 = scmp.lt.u32.totalorder %s2851_s6, %s2973_s2 }
 0x1d4   : > { %p2461_p11 = scmp.lt.u32.totalorder %s2459_s23, %s2455_s7  ;;  %p2463_p4 = scmp.lt.u32.totalorder %s2455_s7, %s2851_s6 }
 0x1d5   : > { %p2457_p2 = pnand %p2456_p9, %p2702_p12 }
 0x1d6   : > { %p2462_p1 = por %p2461_p11, %p2460_p5 }
 0x1d7   : > { %p2458_p0 = pneg %p2457_p2 }
 0x1d8   : > { %p2464_p6 = por %p2463_p4, %p2462_p1 }
 0x1da   : > { %p2465_p8 = pnand %p2464_p6, %p2458_p0 }
 0x1dc   : > { %2468 = shalt.err (!%p2465_p8)
}
 0x1dd   : > { %s2580_s11 = smov 64   ;;  %s2581_s25 = smov 4   ;;  %v1407_v47 = vadd.f32 %v1406_v45, %v1405_v43  ;;  %v1475_v48 = vrot.slane %v1474_v46, 4 }
 0x1de   : > { %2188 = dma.vmem_to_hbm [thread:$0]  (%p2702_p12), %s2853_s28, 2048, %s2851_s6, %s1484_s9, %s2580_s11, %s2580_s11, %s2581_s25  }
 0x1df   : > { %v1408_v49 = vrot.slane %v1407_v47, 2  ;;  %v1476_v50 = vadd.f32 %v1475_v48, %v1474_v46  ;;  %s1488_s12 = sand.u32 1, %s2630_s19   ;;  %s1824_s13 = sshll.u32 %s2630_s19, 7 }
 0x1e0   : > { %s242_s24 = scalar_lea.vmem [#allocation8], %s1689_s26  ;;  %s2887_s8 = scalar_lea.vmem [#allocation10], %s1689_s26 }
 0x1e1   : > { %v1409_v51 = vadd.f32 %v1408_v49, %v1407_v47  ;;  %v1477_v52 = vrot.slane %v1476_v50, 2  ;;  %s1523_s7 = sshll.u32 %s242_s24, 4  ;;  %s1536_s21 = sshll.u32 %s2887_s8, 4  ;;  %s2895_s7 = int_to_ptr.vmem [resolvable:$true] %s1523_s7  ;;  %s2902_s21 = int_to_ptr.vmem [resolvable:$true] %s1536_s21 }
 0x1e2   : > { %s2893_s9 = scalar_lea.hbm %s2974_s3, %s1824_s13  ;;  %s2900_s14 = scalar_lea.hbm %s2975_s4, %s1824_s13 }
 0x1e3   : > { %v1478_v53 = vadd.f32 %v1477_v52, %v1476_v50  ;;  %v1410_v54 = vrot.slane %v1409_v51, 1  ;;  %s2904_s26 = scalar_lea.sflag [#allocation9], %s1488_s12  ;;  %s2469_s10 = scalar_lea.vmem %s2895_s7, 128 }
 0x1e4   : > { %p2470_p10 = scmp.ne.s32.totalorder %s2895_s7, %s2469_s10  ;;  %s2582_s29 = smov [#allocation8]  }
 0x1e5   : > { %v1411_v55 = vadd.f32 %v1410_v54, %v1409_v51  ;;  %v1479_v56 = vrot.slane %v1478_v53, 1  ;;  %s2473_s11 = sshll.u32 %s2582_s29, 4  ;;  %s2474_s11 = int_to_ptr.vmem [resolvable:$false] %s2473_s11 }
 0x1e6   : > { %p2471_p13 = pnand %p2470_p10, %p2702_p12  ;;  %s2475_s25 = scalar_lea.vmem %s2474_s11, 256 }
 0x1e7   : > { %1481 = vst [vmem:[%s242_s24] sm:$0xff] %v1411_v55  ;;  %v1480_v57 = vadd.f32 %v1479_v56, %v1478_v53  ;;  %p2476_p7 = scmp.lt.s32.totalorder %s2895_s7, %s2474_s11  ;;  %p2477_p9 = scmp.lt.s32.totalorder %s2475_s25, %s2469_s10 }
 0x1e8   : > { %p2472_p3 = pneg %p2471_p13 }
 0x1e9   : > { %p2478_p2 = por %p2477_p9, %p2476_p7 }
 0x1eb   : > { %p2479_p0 = pnand %p2478_p2, %p2472_p3 }
 0x1ed   : > { %2482 = shalt.err (!%p2479_p0)
}
 0x1ee   : > { %s2483_s12 = scalar_lea.hbm %s2893_s9, 128  ;;  %s2487_s28 = scalar_lea.hbm %s2974_s3, 256 }
 0x1ef   : > { %p2484_p5 = scmp.ne.s32.totalorder %s2893_s9, %s2483_s12  ;;  %p2488_p4 = scmp.lt.u32.totalorder %s2893_s9, %s2974_s3 }
 0x1f0   : > { %p2489_p6 = scmp.lt.u32.totalorder %s2487_s28, %s2483_s12  ;;  %p2491_p10 = scmp.lt.u32.totalorder %s2483_s12, %s2893_s9 }
 0x1f1   : > { %p2485_p11 = pnand %p2484_p5, %p2702_p12 }
 0x1f2   : > { %p2490_p8 = por %p2489_p6, %p2488_p4 }
 0x1f3   : > { %p2486_p1 = pneg %p2485_p11 }
 0x1f4   : > { %p2492_p13 = por %p2491_p10, %p2490_p8 }
 0x1f6   : > { %p2493_p3 = pnand %p2492_p13, %p2486_p1 }
 0x1f8   : > { %2496 = shalt.err (!%p2493_p3)
}
 0x1f9   : > { %2189 = dma.vmem_to_hbm [thread:$0]  (%p2702_p12), %s2895_s7, 128, %s2893_s9, %s2904_s26   ;;  %1482 = vst [vmem:[%s2887_s8] sm:$0xff] %v1480_v57 }
 0x1fa   : > { %s2497_s23 = scalar_lea.vmem %s2902_s21, 128  ;;  %s2583_s10 = smov [#allocation10]  }
 0x1fb   : > { %p2498_p7 = scmp.ne.s32.totalorder %s2902_s21, %s2497_s23  ;;  %s2501_s29 = sshll.u32 %s2583_s10, 4  ;;  %s2502_s29 = int_to_ptr.vmem [resolvable:$false] %s2501_s29 }
 0x1fc   : > { %s2503_s11 = scalar_lea.vmem %s2502_s29, 256  ;;  %p2504_p0 = scmp.lt.s32.totalorder %s2902_s21, %s2502_s29 }
 0x1fd   : > { %p2499_p9 = pnand %p2498_p7, %p2702_p12  ;;  %p2505_p5 = scmp.lt.s32.totalorder %s2503_s11, %s2497_s23 }
 0x1ff   : > { %p2500_p2 = pneg %p2499_p9  ;;  %p2506_p11 = por %p2505_p5, %p2504_p0 }
 0x201   : > { %p2507_p1 = pnand %p2506_p11, %p2500_p2 }
 0x203   : > { %2510 = shalt.err (!%p2507_p1)
}
 0x204   : > { %s2511_s7 = scalar_lea.hbm %s2900_s14, 128  ;;  %s2515_s25 = scalar_lea.hbm %s2975_s4, 256 }
 0x205   : > { %p2512_p4 = scmp.ne.s32.totalorder %s2900_s14, %s2511_s7  ;;  %p2516_p10 = scmp.lt.u32.totalorder %s2900_s14, %s2975_s4 }
 0x206   : > { %p2517_p13 = scmp.lt.u32.totalorder %s2515_s25, %s2511_s7  ;;  %p2519_p7 = scmp.lt.u32.totalorder %s2511_s7, %s2900_s14 }
 0x207   : > { %p2513_p6 = pnand %p2512_p4, %p2702_p12 }
 0x208   : > { %p2518_p3 = por %p2517_p13, %p2516_p10 }
 0x209   : > { %p2514_p8 = pneg %p2513_p6 }
 0x20a   : > { %p2520_p9 = por %p2519_p7, %p2518_p3 }
 0x20c   : > { %p2521_p2 = pnand %p2520_p9, %p2514_p8 }
 0x20e   : > { %2524 = shalt.err (!%p2521_p2)
}
 0x20f   : > { %2190 = dma.vmem_to_hbm [thread:$0]  (%p2702_p12), %s2902_s21, 128, %s2900_s14, %s2904_s26  }
 0x210 PF: > { %s1548_s24 = sand.u32 1, %s2559_s15   ;;  %p2990_p0 = scmp.ne.s32.totalorder %s2980_s22, 0 }
 0x211   : > { %p2991_p5 = scmp.ge.s32.totalorder %s2571_s18, 2  ;;  %s1549_s28 = scalar_lea.sflag [#allocation4], %s1548_s24 }
 0x213   : > { %p2203_p11 = pnand %p2991_p5, %p2990_p0 }
 0x215   : > { %2550 = dma.done.wait (!%p2203_p11), %s1549_s28, 2048  }
 0x216   : > { %2552 = vsyncadd (!%p2203_p11), %s1549_s28, 4294965248  ;;  %s1557_s6 = sand.u32 1, %s1677_s20  }
 0x217   : > { %s1558_s19 = scalar_lea.sflag [#allocation9], %s1557_s6 }
 0x218   : > { %2554 = dma.done.wait (!%p2203_p11), %s1558_s19, 256  }
 0x219   : > { %2556 = vsyncadd (!%p2203_p11), %s1558_s19, 4294967040  ;;  %p22_p12 = scmp.ge.s32.totalorder %s2667_s27, 4   ;;  %s2992_s15 = smov %s2563_s16 }
 0x21a   : > { %s2993_s16 = smov %s2567_s17  ;;  %s2994_s17 = smov %s2698_s30 }
 0x21b   : > { %s2995_s18 = smov %s2667_s27  ;;  %24 = sbr.rel (!%p22_p12) target bundleno = 8 (0x8), region = 109 }
 0x222   :  { %1572 = vsyncpa [#allocation3], 1 }
 0x223   :  { %1574 = vsyncpa [#allocation3 + $0x1], 1 }
 0x224   :  { %1575 = vsyncpa [#allocation6], 1 }
 0x225   :  { %1576 = vsyncpa [#allocation4], 1 }
 0x226   :  { %1578 = vsyncpa [#allocation4 + $0x1], 1 }
 0x227   :  { %1579 = vsyncpa [#allocation9], 1 }
 0x228   :  { %1581 = vsyncpa [#allocation9 + $0x1], 1 }

</bundles_post_ra>
